<compile_context>
chip_gen: v5e
topology: v5e:2x2
jax: 0.10.0
libtpu: 0.0.40
codegen_flags: <defaults>
</compile_context>

<pallas_src>
import functools

import jax
import jax.numpy as jnp
from jax import lax
from jax.experimental import pallas as pl
from jax.experimental.pallas import tpu as pltpu

NUM_CLASSES = 4


def _ce_pseudo_kernel(true_labs, collapsed_idx, ignore_index, n_rows, tile_rows,
                      logits_ref, labels_ref, sum_ref, cnt_ref):
    """Per-tile: pseudo log-probs, gather by label, accumulate NLL.

    logits_ref: (C=4, TS, 128) f32   labels_ref: (TS, 128) i32
    sum_ref, cnt_ref: (1, 1) f32 accumulators resident across the row axis.
    """
    j = pl.program_id(1)

    @pl.when(j == 0)
    def _init():
        sum_ref[...] = jnp.zeros_like(sum_ref)
        cnt_ref[...] = jnp.zeros_like(cnt_ref)

    xs = [logits_ref[c].astype(jnp.float32) for c in range(NUM_CLASSES)]
    labels = labels_ref[...]                                   # (TS, 128) i32

    # Shared max over the 4 class slabs: 3 elementwise VPU maximums (no XLU).
    m = jnp.maximum(jnp.maximum(xs[0], xs[1]), jnp.maximum(xs[2], xs[3]))
    es = [jnp.exp(x - m) for x in xs]                          # 4 EUP exps/pixel
    s_all = (es[0] + es[1]) + (es[2] + es[3])
    log_s_all = jnp.log(s_all)
    den = m + log_s_all                                        # logsumexp(x)

    un_labels = [c for c in range(NUM_CLASSES) if c not in true_labs]

    val = jnp.zeros_like(m)
    # Collapsed "unknown" channel first; true-label channels overwrite it
    # below, mirroring the PyTorch in-place assignment order.
    if un_labels:
        s_un = es[un_labels[0]]
        for c in un_labels[1:]:
            s_un = s_un + es[c]
        v_un = jnp.log(s_un) - log_s_all                       # lse_un - den
        val = jnp.where(labels == collapsed_idx, v_un, val)
    for c in true_labs:
        val = jnp.where(labels == c, xs[c] - den, val)
    # Channels that are neither true nor collapsed keep outputs == 0 (no-op).

    valid = labels != ignore_index
    if n_rows % tile_rows != 0:
        # Tail row-block: rows past the array hold undefined data; mask them.
        rows = lax.broadcasted_iota(jnp.int32, labels.shape, 0) + j * tile_rows
        valid = jnp.logical_and(valid, rows < n_rows)

    nll = jnp.where(valid, -val, 0.0)
    sum_ref[...] += jnp.sum(nll)
    cnt_ref[...] += jnp.sum(valid.astype(jnp.float32))


def cross_entropy_pseudo(inputs, targets, true_labs, *,
                         reduction="mean", ignore_index=-100,
                         tile_pixels=131072):
    """JAX/Pallas equivalent of CrossEntropyPseudo.forward.

    inputs:  (N, 4, H, W) float32 logits (NCHW, as in PyTorch)
    targets: (N, H, W) int labels in [0, 4) or ignore_index
    true_labs: static tuple/list of "true" class indices
    """
    N, C, H, W = inputs.shape
    assert C == NUM_CLASSES
    assert tile_pixels % 1024 == 0, "tile_pixels must be a multiple of 1024"
    HW = H * W

    # NCHW is already contiguous as (N, C, H*W): free reshape, no transpose.
    logits = inputs.reshape(N, C, HW)
    labels = targets.reshape(N, HW).astype(jnp.int32)

    if HW % 128 != 0:
        # TODO(synk): mask the partial last lane-row in-kernel instead of padding.
        pad = 128 - HW % 128
        logits = jnp.pad(logits, ((0, 0), (0, 0), (0, pad)))
        labels = jnp.pad(labels, ((0, 0), (0, pad)), constant_values=ignore_index)
        HW += pad

    R = HW // 128                              # pixel rows of 128 lanes each
    logits = logits.reshape(N, C, R, 128)
    labels = labels.reshape(N, R, 128)

    # Row tile: multiple of 8 (or the full row count). Default 1024 rows
    # (131072 pixels) -> ~2.5 MiB input/step, ~5 MiB double-buffered VMEM:
    # comfortably under default scoped VMEM on v5e/v6e/v7x.
    tile_rows = tile_pixels // 128
    if R <= tile_rows:
        tile_rows = R

    grid = (N, pl.cdiv(R, tile_rows))

    true_labs = tuple(int(c) for c in true_labs)
    un_labels = [c for c in range(NUM_CLASSES) if c not in true_labs]
    collapsed_idx = (0 if 0 in un_labels else 1) if un_labels else -1

    kernel = functools.partial(_ce_pseudo_kernel, true_labs, collapsed_idx,
                               int(ignore_index), R, tile_rows)

    sum_out, cnt_out = pl.pallas_call(
        kernel,
        out_shape=(jax.ShapeDtypeStruct((N, 1, 1), jnp.float32),
                   jax.ShapeDtypeStruct((N, 1, 1), jnp.float32)),
        grid_spec=pltpu.PrefetchScalarGridSpec(
            num_scalar_prefetch=0,
            grid=grid,
            in_specs=[pl.BlockSpec((None, C, tile_rows, 128),
                                   lambda n, j: (n, 0, j, 0)),
                      pl.BlockSpec((None, tile_rows, 128),
                                   lambda n, j: (n, j, 0))],
            out_specs=(pl.BlockSpec((None, 1, 1), lambda n, j: (n, 0, 0)),
                       pl.BlockSpec((None, 1, 1), lambda n, j: (n, 0, 0)))),
        compiler_params=pltpu.CompilerParams(
            dimension_semantics=("parallel", "arbitrary")),
    )(logits, labels)

    total = jnp.sum(sum_out)
    count = jnp.sum(cnt_out)
    if reduction == "mean":
        return total / count          # matches torch (nan if no valid pixels)
    elif reduction == "sum":
        return total
    else:
        raise ValueError("only 'mean'/'sum' reductions supported")
        # TODO(synk): reduction='none' would need a per-pixel output map.


def _reference(inputs, targets, true_labs, ignore_index=-100):
    """Pure-JAX reference mirroring the PyTorch forward (for verification)."""
    true_labs = tuple(int(c) for c in true_labs)
    un_labels = [c for c in range(NUM_CLASSES) if c not in true_labs]
    den = jax.nn.logsumexp(inputs, axis=1)                      # (N,H,W)
    outputs = jnp.zeros_like(inputs)
    if un_labels:
        lse_un = jax.nn.logsumexp(inputs[:, jnp.array(un_labels)], axis=1)
        ch = 0 if 0 in un_labels else 1
        outputs = outputs.at[:, ch].set(lse_un - den)
    for c in true_labs:
        outputs = outputs.at[:, c].set(inputs[:, c] - den)
    labels = targets
    valid = labels != ignore_index
    safe = jnp.where(valid, labels, 0)
    gathered = jnp.take_along_axis(outputs, safe[:, None], axis=1)[:, 0]
    nll = jnp.where(valid, -gathered, 0.0)
    return jnp.sum(nll) / jnp.sum(valid.astype(jnp.float32))


if __name__ == "__main__":
    key = jax.random.PRNGKey(0)
    k1, k2, k3 = jax.random.split(key, 3)

    N, C, H, W = 2, 4, 16, 16
    inputs = jax.random.normal(k1, (N, C, H, W), dtype=jnp.float32)
    targets = jax.random.randint(k2, (N, H, W), 0, C, dtype=jnp.int32)
    # Sprinkle some ignored pixels.
    ignore_mask = jax.random.uniform(k3, (N, H, W)) < 0.1
    targets = jnp.where(ignore_mask, jnp.int32(-100), targets)

    true_labs = (2, 3)   # classes with real labels; 0,1 are "unlabeled"

    loss = cross_entropy_pseudo(inputs, targets, true_labs)
    loss = jax.block_until_ready(loss)

    ref = _reference(inputs, targets, true_labs)
    assert jnp.allclose(loss, ref, atol=1e-5, rtol=1e-5), (loss, ref)

    print("KERNEL_OK")
</pallas_src>

<mosaic_0001>
module attributes {stable_mosaic.version = 11 : i64} {
  func.func @_ce_pseudo_kernel(%arg0: i32, %arg1: i32, %arg2: memref<1x4x2x128xf32, #tpu.memory_space<vmem>>, %arg3: memref<1x2x128xi32, #tpu.memory_space<vmem>>, %arg4: memref<1x1x1xf32, #tpu.memory_space<vmem>>, %arg5: memref<1x1x1xf32, #tpu.memory_space<vmem>>) attributes {dimension_semantics = [#tpu.dimension_semantics<parallel>, #tpu.dimension_semantics<arbitrary>], iteration_bounds = array<i64: 2, 1>, scalar_prefetch = 0 : i64, scratch_operands = 0 : i64, tpu.core_type = #tpu.core_type<tc>, window_params = [{transform_indices = @transform_0, window_bounds = array<i64: 1, 4, 2, 128>}, {transform_indices = @transform_1, window_bounds = array<i64: 1, 2, 128>}, {transform_indices = @transform_2, window_bounds = array<i64: 1, 1, 1>}, {transform_indices = @transform_3, window_bounds = array<i64: 1, 1, 1>}]} {
    %c0_i32 = arith.constant 0 : i32
    %0 = arith.cmpi eq, %arg1, %c0_i32 : i32
    %1 = arith.extui %0 : i1 to i32
    %c0_i32_0 = arith.constant 0 : i32
    %2 = arith.cmpi ne, %1, %c0_i32_0 : i32
    scf.if %2 {
      %cst_33 = arith.constant 0.000000e+00 : f32
      %74 = vector.broadcast %cst_33 : f32 to vector<1x1xf32>
      %c0_34 = arith.constant 0 : index
      %c0_35 = arith.constant 0 : index
      %c0_36 = arith.constant 0 : index
      %75 = vector.load %arg4[%c0_34, %c0_35, %c0_36] : memref<1x1x1xf32, #tpu.memory_space<vmem>>, vector<1x1x1xf32>
      %76 = vector.shape_cast %75 : vector<1x1x1xf32> to vector<1x1xf32>
      %77 = vector.shape_cast %74 : vector<1x1xf32> to vector<1x1x1xf32>
      tpu.vector_store %arg4[%c0_34, %c0_35, %c0_36], %77 {strides = array<i32>} : memref<1x1x1xf32, #tpu.memory_space<vmem>>, vector<1x1x1xf32>,
      %cst_37 = arith.constant 0.000000e+00 : f32
      %78 = vector.broadcast %cst_37 : f32 to vector<1x1xf32>
      %c0_38 = arith.constant 0 : index
      %c0_39 = arith.constant 0 : index
      %c0_40 = arith.constant 0 : index
      %79 = vector.load %arg5[%c0_38, %c0_39, %c0_40] : memref<1x1x1xf32, #tpu.memory_space<vmem>>, vector<1x1x1xf32>
      %80 = vector.shape_cast %79 : vector<1x1x1xf32> to vector<1x1xf32>
      %81 = vector.shape_cast %78 : vector<1x1xf32> to vector<1x1x1xf32>
      tpu.vector_store %arg5[%c0_38, %c0_39, %c0_40], %81 {strides = array<i32>} : memref<1x1x1xf32, #tpu.memory_space<vmem>>, vector<1x1x1xf32>,
    } else {
    }
    %c0 = arith.constant 0 : index
    %c0_1 = arith.constant 0 : index
    %c0_2 = arith.constant 0 : index
    %c0_3 = arith.constant 0 : index
    %3 = vector.load %arg2[%c0, %c0_1, %c0_2, %c0_3] : memref<1x4x2x128xf32, #tpu.memory_space<vmem>>, vector<1x1x2x128xf32>
    %4 = vector.shape_cast %3 : vector<1x1x2x128xf32> to vector<2x128xf32>
    %c0_4 = arith.constant 0 : index
    %c1 = arith.constant 1 : index
    %c0_5 = arith.constant 0 : index
    %c0_6 = arith.constant 0 : index
    %5 = vector.load %arg2[%c0_4, %c1, %c0_5, %c0_6] : memref<1x4x2x128xf32, #tpu.memory_space<vmem>>, vector<1x1x2x128xf32>
    %6 = vector.shape_cast %5 : vector<1x1x2x128xf32> to vector<2x128xf32>
    %c0_7 = arith.constant 0 : index
    %c2 = arith.constant 2 : index
    %c0_8 = arith.constant 0 : index
    %c0_9 = arith.constant 0 : index
    %7 = vector.load %arg2[%c0_7, %c2, %c0_8, %c0_9] : memref<1x4x2x128xf32, #tpu.memory_space<vmem>>, vector<1x1x2x128xf32>
    %8 = vector.shape_cast %7 : vector<1x1x2x128xf32> to vector<2x128xf32>
    %c0_10 = arith.constant 0 : index
    %c3 = arith.constant 3 : index
    %c0_11 = arith.constant 0 : index
    %c0_12 = arith.constant 0 : index
    %9 = vector.load %arg2[%c0_10, %c3, %c0_11, %c0_12] : memref<1x4x2x128xf32, #tpu.memory_space<vmem>>, vector<1x1x2x128xf32>
    %10 = vector.shape_cast %9 : vector<1x1x2x128xf32> to vector<2x128xf32>
    %c0_13 = arith.constant 0 : index
    %c0_14 = arith.constant 0 : index
    %c0_15 = arith.constant 0 : index
    %11 = vector.load %arg3[%c0_13, %c0_14, %c0_15] : memref<1x2x128xi32, #tpu.memory_space<vmem>>, vector<1x2x128xi32>
    %12 = vector.shape_cast %11 : vector<1x2x128xi32> to vector<2x128xi32>
    %13 = arith.maximumf %4, %6 : vector<2x128xf32>
    %14 = arith.maximumf %8, %10 : vector<2x128xf32>
    %15 = arith.maximumf %13, %14 : vector<2x128xf32>
    %16 = arith.subf %4, %15 : vector<2x128xf32>
    %17 = math.exp %16 : vector<2x128xf32>
    %18 = arith.subf %6, %15 : vector<2x128xf32>
    %19 = math.exp %18 : vector<2x128xf32>
    %20 = arith.subf %8, %15 : vector<2x128xf32>
    %21 = math.exp %20 : vector<2x128xf32>
    %22 = arith.subf %10, %15 : vector<2x128xf32>
    %23 = math.exp %22 : vector<2x128xf32>
    %24 = arith.addf %17, %19 : vector<2x128xf32>
    %25 = arith.addf %21, %23 : vector<2x128xf32>
    %26 = arith.addf %24, %25 : vector<2x128xf32>
    %27 = math.log %26 : vector<2x128xf32>
    %28 = arith.addf %15, %27 : vector<2x128xf32>
    %cst = arith.constant 0.000000e+00 : f32
    %29 = vector.broadcast %cst : f32 to vector<2x128xf32>
    %30 = arith.addf %17, %19 : vector<2x128xf32>
    %31 = math.log %30 : vector<2x128xf32>
    %32 = arith.subf %31, %27 : vector<2x128xf32>
    %c0_i32_16 = arith.constant 0 : i32
    %33 = vector.broadcast %c0_i32_16 : i32 to vector<2x128xi32>
    %34 = arith.cmpi eq, %12, %33 : vector<2x128xi32>
    %35 = arith.select %34, %32, %29 : vector<2x128xi1>, vector<2x128xf32>
    %c2_i32 = arith.constant 2 : i32
    %36 = vector.broadcast %c2_i32 : i32 to vector<2x128xi32>
    %37 = arith.cmpi eq, %12, %36 : vector<2x128xi32>
    %38 = arith.subf %8, %28 : vector<2x128xf32>
    %39 = arith.select %37, %38, %35 : vector<2x128xi1>, vector<2x128xf32>
    %c3_i32 = arith.constant 3 : i32
    %40 = vector.broadcast %c3_i32 : i32 to vector<2x128xi32>
    %41 = arith.cmpi eq, %12, %40 : vector<2x128xi32>
    %42 = arith.subf %10, %28 : vector<2x128xf32>
    %43 = arith.select %41, %42, %39 : vector<2x128xi1>, vector<2x128xf32>
    %c-100_i32 = arith.constant -100 : i32
    %44 = vector.broadcast %c-100_i32 : i32 to vector<2x128xi32>
    %45 = arith.cmpi ne, %12, %44 : vector<2x128xi32>
    %cst_17 = arith.constant 0.000000e+00 : f32
    %46 = vector.broadcast %cst_17 : f32 to vector<2x128xf32>
    %47 = arith.subf %46, %43 : vector<2x128xf32>
    %cst_18 = arith.constant 0.000000e+00 : f32
    %48 = vector.broadcast %cst_18 : f32 to vector<2x128xf32>
    %49 = arith.select %45, %47, %48 : vector<2x128xi1>, vector<2x128xf32>
    %c0_19 = arith.constant 0 : index
    %c0_20 = arith.constant 0 : index
    %c0_21 = arith.constant 0 : index
    %50 = vector.load %arg4[%c0_19, %c0_20, %c0_21] : memref<1x1x1xf32, #tpu.memory_space<vmem>>, vector<1x1x1xf32>
    %51 = vector.shape_cast %50 : vector<1x1x1xf32> to vector<1x1xf32>
    %52 = vector.shape_cast %49 : vector<2x128xf32> to vector<1x2x128xf32>
    %cst_22 = arith.constant dense<0.000000e+00> : vector<1xf32>
    %53 = vector.multi_reduction <add>, %52, %cst_22 [1, 2] : vector<1x2x128xf32> to vector<1xf32>
    %54 = vector.shape_cast %53 : vector<1xf32> to vector<1x1x1xf32>
    %55 = vector.extract %54[0, 0, 0] : f32 from vector<1x1x1xf32>
    %56 = vector.broadcast %55 : f32 to vector<1x1xf32>
    %57 = arith.addf %51, %56 : vector<1x1xf32>
    %c0_23 = arith.constant 0 : index
    %c0_24 = arith.constant 0 : index
    %c0_25 = arith.constant 0 : index
    %58 = vector.load %arg4[%c0_23, %c0_24, %c0_25] : memref<1x1x1xf32, #tpu.memory_space<vmem>>, vector<1x1x1xf32>
    %59 = vector.shape_cast %58 : vector<1x1x1xf32> to vector<1x1xf32>
    %60 = vector.shape_cast %57 : vector<1x1xf32> to vector<1x1x1xf32>
    tpu.vector_store %arg4[%c0_23, %c0_24, %c0_25], %60 {strides = array<i32>} : memref<1x1x1xf32, #tpu.memory_space<vmem>>, vector<1x1x1xf32>,
    %c0_26 = arith.constant 0 : index
    %c0_27 = arith.constant 0 : index
    %c0_28 = arith.constant 0 : index
    %61 = vector.load %arg5[%c0_26, %c0_27, %c0_28] : memref<1x1x1xf32, #tpu.memory_space<vmem>>, vector<1x1x1xf32>
    %62 = vector.shape_cast %61 : vector<1x1x1xf32> to vector<1x1xf32>
    %63 = arith.extui %45 : vector<2x128xi1> to vector<2x128xi32>
    %64 = arith.sitofp %63 : vector<2x128xi32> to vector<2x128xf32>
    %65 = vector.shape_cast %64 : vector<2x128xf32> to vector<1x2x128xf32>
    %cst_29 = arith.constant dense<0.000000e+00> : vector<1xf32>
    %66 = vector.multi_reduction <add>, %65, %cst_29 [1, 2] : vector<1x2x128xf32> to vector<1xf32>
    %67 = vector.shape_cast %66 : vector<1xf32> to vector<1x1x1xf32>
    %68 = vector.extract %67[0, 0, 0] : f32 from vector<1x1x1xf32>
    %69 = vector.broadcast %68 : f32 to vector<1x1xf32>
    %70 = arith.addf %62, %69 : vector<1x1xf32>
    %c0_30 = arith.constant 0 : index
    %c0_31 = arith.constant 0 : index
    %c0_32 = arith.constant 0 : index
    %71 = vector.load %arg5[%c0_30, %c0_31, %c0_32] : memref<1x1x1xf32, #tpu.memory_space<vmem>>, vector<1x1x1xf32>
    %72 = vector.shape_cast %71 : vector<1x1x1xf32> to vector<1x1xf32>
    %73 = vector.shape_cast %70 : vector<1x1xf32> to vector<1x1x1xf32>
    tpu.vector_store %arg5[%c0_30, %c0_31, %c0_32], %73 {strides = array<i32>} : memref<1x1x1xf32, #tpu.memory_space<vmem>>, vector<1x1x1xf32>,
    return
  }
  func.func @transform_0(%arg0: i32, %arg1: i32) -> (i32, i32, i32, i32) {
    %c0_i32 = arith.constant 0 : i32
    %c0_i32_0 = arith.constant 0 : i32
    %c0_i32_1 = arith.constant 0 : i32
    return %arg0, %c0_i32, %arg1, %c0_i32_0 : i32, i32, i32, i32
  }
  func.func @transform_1(%arg0: i32, %arg1: i32) -> (i32, i32, i32) {
    %c0_i32 = arith.constant 0 : i32
    %c0_i32_0 = arith.constant 0 : i32
    return %arg0, %arg1, %c0_i32 : i32, i32, i32
  }
  func.func @transform_2(%arg0: i32, %arg1: i32) -> (i32, i32, i32) {
    %c0_i32 = arith.constant 0 : i32
    %c0_i32_0 = arith.constant 0 : i32
    %c0_i32_1 = arith.constant 0 : i32
    return %arg0, %c0_i32, %c0_i32_0 : i32, i32, i32
  }
  func.func @transform_3(%arg0: i32, %arg1: i32) -> (i32, i32, i32) {
    %c0_i32 = arith.constant 0 : i32
    %c0_i32_0 = arith.constant 0 : i32
    %c0_i32_1 = arith.constant 0 : i32
    return %arg0, %c0_i32, %c0_i32_0 : i32, i32, i32
  }
}

</mosaic_0001>

<bundles_post_ra>
// kernel: tpu_custom_call.1
= control target key start
LH: loop header
LB: loop body
LE: loop exit
PB: predicated region body
PF: predicated region fallthrough
CT: control target
= control target key end

     0   :  { %9 = vsyncpa [#allocation3], 0  ;;  %s806_s0 = inlined_call_operand.hbm [shape: f32[2,4,2,128], index: 0, kind: input, shape index: {}]   ;;  %s807_s1 = inlined_call_operand.hbm [shape: s32[2,2,128], index: 1, kind: input, shape index: {}]   ;;  %s808_s2 = inlined_call_operand.vmem [shape: f32[2,1,1], index: 2, kind: output, shape index: {0}]   ;;  %s809_s3 = inlined_call_operand.vmem [shape: f32[2,1,1], index: 3, kind: output, shape index: {1}]  }
   0x1   :  { %11 = vsyncpa [#allocation3 + $0x1], 0 }
   0x2   :  { %12 = vsyncpa [#allocation5], 0 }
   0x3   :  { %14 = vsyncpa [#allocation5 + $0x1], 0  ;;  %s692_s12 = smov 0   ;;  %s694_s13 = smov 0  }
   0x4   :  { %s696_s14 = smov 0   ;;  %s698_s15 = smov 0  }
   0x5   :  { %s700_s16 = smov 0   ;;  %s702_s17 = smov 0  }
   0x6 LB: > { %s455_s18 = sadd.s32 4294967295, %s667_s17   ;;  %s32_s19 = sadd.s32 1, %s663_s16  ;;  %s667_s17 = sphi %s702_s17, %s20_s17   ;;  %s663_s16 = sphi %s700_s16, %s817_s16   ;;  %s659_s15 = sphi %s698_s15, %s816_s15   ;;  %s655_s14 = sphi %s696_s14, %s815_s14   ;;  %s651_s13 = sphi %s694_s13, %s814_s13   ;;  %s647_s12 = sphi %s692_s12, %s813_s12  }
   0x7   : > { %p34_p0 = scmp.ge.s32.totalorder %s32_s19, 2  ;;  %s41_s20 = sadd.s32 1, %s655_s14 }
   0x8   : > { %p48_p1 = scmp.ne.s32.totalorder %s655_s14, %s651_s13  ;;  %p49_p2 = scmp.eq.s32.totalorder %s667_s17, 0 }
   0x9   : > { %s819_s19 = smov (%p34_p0, %s32_s19), 0  ;;  %p54_p4 = scmp.ne.s32.totalorder %s651_s13, %s647_s12 }
   0xa   : > { %p728_p3 = por %p49_p2, %p48_p1  ;;  %s36_s22 = ssub.s32 %s663_s16, %s819_s19 }
   0xb   : > { %p55_p5 = scmp.eq.s32.totalorder %s455_s18, 0  ;;  %p39_p6 = scmp.eq.s32.totalorder %s36_s22, 0 }
   0xc   : > { %p489_p8 = scmp.lt.s32.totalorder %s667_s17, 2  ;;  %s158_s25 = sand.u32 1, %s655_s14  }
   0xd   : > { %p735_p7 = por %p55_p5, %p54_p4  ;;  %s473_s26 = sshll.u32 %s663_s16, 3 }
   0xe   : > { %s741_s24 = scalar_select %p39_p6, %s655_s14, %s41_s20  }
   0xf   : > { %s459_s27 = sshll.u32 %s158_s25, 3  ;;  %s168_s30 = scalar_lea.hbm %s806_s0, %s473_s26 }
  0x10   : > { %s169_s4 = sshll.u32 %s168_s30, 4  ;;  %s162_s5 = scalar_lea.vmem [#allocation2], %s459_s27  ;;  %s170_s4 = int_to_ptr.hbm [resolvable:$true] %s169_s4 }
  0x11   : > { %s171_s6 = sshll.u32 %s162_s5, 4  ;;  %p750_p9 = pnand %p489_p8, %p728_p3  ;;  %s172_s6 = int_to_ptr.vmem [resolvable:$true] %s171_s6 }
  0x12   : > { %p464_p10 = scmp.ge.s32.totalorder %s667_s17, 1  ;;  %p199_p11 = scmp.lt.s32.totalorder %s667_s17, 3 }
  0x13   : > { %s159_s8 = scalar_lea.sflag [#allocation3], %s158_s25  ;;  %s669_s9 = smov 32  }
  0x14   : > { %s670_s10 = smov 2   ;;  %p200_p12 = pnand %p464_p10, %p199_p11 }
  0x15   : > { %485 = dma.hbm_to_vmem [thread:$0]  (!%p750_p9), %s170_s4, 128, %s172_s6, %s159_s8, %s669_s9, %s669_s9, %s670_s10  }
  0x16   : > { %s462_s11 = sshll.u32 %s158_s25, 1  ;;  %s463_s12 = sshll.u32 %s663_s16, 1 }
  0x17   : > { %s190_s21 = scalar_lea.hbm %s807_s1, %s463_s12  ;;  %s185_s26 = scalar_lea.vmem [#allocation4], %s462_s11 }
  0x18   : > { %s192_s22 = sshll.u32 %s190_s21, 4  ;;  %s194_s27 = sshll.u32 %s185_s26, 4  ;;  %s193_s22 = int_to_ptr.hbm [resolvable:$true] %s192_s22  ;;  %s195_s27 = int_to_ptr.vmem [resolvable:$true] %s194_s27 }
  0x19   : > { %s182_s28 = scalar_lea.sflag [#allocation5], %s158_s25  ;;  %203 = sbr.rel (%p200_p12) target bundleno = 267 (0x10b), region = 28 }
  0x1a   : > { %488 = dma.hbm_to_vmem [thread:$0]  (!%p750_p9), %s193_s22, 32, %s195_s27, %s182_s28  }
  0x1b   : > { %s205_s29 = sand.u32 (!%p200_p12), 1, %s651_s13  }
  0x1c   : > { %s465_s30 = sshll.u32 (!%p200_p12), %s205_s29, 3  ;;  %s206_s4 = scalar_lea.sflag (!%p200_p12), [#allocation3], %s205_s29 }
  0x1d   : > { %s209_s5 = scalar_lea.vmem (!%p200_p12), [#allocation2], %s465_s30 }
  0x1e   : > { %638 = dma.done.wait (%p735_p7), %s206_s4, 128  }
  0x1f   : > { %640 = vsyncadd (%p735_p7), %s206_s4, 4294967168  ;;  %s466_s6 = sshll.u32 %s205_s29, 1  ;;  %s216_s8 = scalar_lea.sflag [#allocation5], %s205_s29 }
  0x20   : > { %s769_s9 = scalar_lea.vmem [#allocation4], %s466_s6 }
  0x21   : > { %642 = dma.done.wait (%p735_p7), %s216_s8, 32  }
  0x22   : > { %644 = vsyncadd (%p735_p7), %s216_s8, 4294967264  ;;  %v262_v0 = vld [vmem:[%s209_s5] sm:$0x3]  ;;  %v467_v1 = vld [vmem:[%s209_s5 + $0x2] sm:$0x3]  ;;  %vm306_vm4 = vcmask 1041408  }
  0x23   : > { %v468_v2 = vld [vmem:[%s209_s5 + $0x4] sm:$0x3]  ;;  %v469_v3 = vld [vmem:[%s209_s5 + $0x6] sm:$0x3]  ;;  %v270_v4 = vmax.f32 %v262_v0, %v467_v1  ;;  %v269_v23 = vld [vmem:[%s769_s9] sm:$0x3] }
  0x24   : > { %v271_v5 = vmax.f32 %v468_v2, %v469_v3  ;;  %vm294_vm0 = vcmp.eq.s32.totalorder %v269_v23, 0  ;;  %vm296_vm1 = vcmp.eq.s32.totalorder %v269_v23, 2  ;;  %vm299_vm2 = vcmp.eq.s32.totalorder %v269_v23, 3  ;;  %p249_p13 = scmp.lt.s32.totalorder %s659_s15, 1 }
  0x25   : > { %vm302_vm3 = vcmp.ne.s32.totalorder %v269_v23, 4294967196  ;;  %v671_v37 = vmov 0.0   ;;  %vm259_vm5 = vcmask 0  }
  0x26   : > { %v272_v6 = vmax.f32 %v270_v4, %v271_v5  ;;  %v470_v38 = vsel %vm302_vm3, 1.0, %v671_v37  ;;  %s821_s15 = smov (!%p249_p13, %s659_s15), 1 }
  0x27   : > { %v324_v39 = vsel %vm306_vm4, %v470_v38, 0.0  ;;  %s251_s7 = scalar_lea.vmem %s808_s2, %s821_s15  ;;  %s254_s12 = scalar_lea.vmem %s809_s3, %s821_s15 }
  0x28   : > { %v273_v7 = vsub.f32 %v262_v0, %v272_v6  ;;  %v276_v8 = vsub.f32 %v467_v1, %v272_v6  ;;  %v279_v9 = vsub.f32 %v468_v2, %v272_v6  ;;  %v282_v10 = vsub.f32 %v469_v3, %v272_v6  ;;  %260 = vst.msk [vmem:[%s251_s7] sm:$0x1] %vm259_vm5, %v671_v37 }
  0x29   : > { %261 = vst.msk [vmem:[%s254_s12] sm:$0x1] %vm259_vm5, %v671_v37 }
  0x2a   : > { %v274_v11 = vmul.f32 1.442695, %v273_v7  ;;  %v277_v12 = vmul.f32 1.442695, %v276_v8  ;;  %v280_v13 = vmul.f32 1.442695, %v279_v9 }
  0x2b   : > { %v283_v14 = vmul.f32 1.442695, %v282_v10 }
  0x2c   : > { %541 = vpow2.f32 %v274_v11 }
  0x2d   : > { %543 = vpow2.f32 %v277_v12 }
  0x2e   : > { %545 = vpow2.f32 %v280_v13 }
  0x2f   : > { %547 = vpow2.f32 %v283_v14  ;;  %v305_v54 = vld [vmem:[%s251_s7] sm:$0x1] }
  0x30   : > { %v321_v57 = vld [vmem:[%s254_s12] sm:$0x1] }
  0x32   : > { %v542_v15 = vpop.eup %541 }
  0x33   : > { %v544_v16 = vpop.eup %543 }
  0x34   : > { %v546_v17 = vpop.eup %545  ;;  %v285_v18 = vadd.f32 %v544_v16, %v542_v15 }
  0x35   : > { %v548_v19 = vpop.eup %547 }
  0x36   : > { %v286_v20 = vadd.f32 %v548_v19, %v546_v17  ;;  %549 = vlog2.f32 %v285_v18 }
  0x38   : > { %v287_v21 = vadd.f32 %v286_v20, %v285_v18 }
  0x3a   : > { %551 = vlog2.f32 %v287_v21 }
  0x3c   : > { %v550_v22 = vpop.eup %549 }
  0x3d   : > { %v292_v24 = vmul.f32 0.6931472, %v550_v22 }
  0x40   : > { %v552_v25 = vpop.eup %551 }
  0x41   : > { %v289_v26 = vmul.f32 0.6931472, %v552_v25 }
  0x43   : > { %v290_v27 = vadd.f32 %v289_v26, %v272_v6  ;;  %v293_v28 = vsub.f32 %v292_v24, %v289_v26 }
  0x45   : > { %v295_v29 = vsel %vm294_vm0, %v293_v28, 0.0  ;;  %v297_v30 = vsub.f32 %v468_v2, %v290_v27  ;;  %v300_v31 = vsub.f32 %v469_v3, %v290_v27 }
  0x47   : > { %v298_v32 = vsel %vm296_vm1, %v297_v30, %v295_v29 }
  0x48   : > { %v301_v33 = vsel %vm299_vm2, %v300_v31, %v298_v32 }
  0x49   : > { %v303_v34 = vsub.f32 0.0, %v301_v33 }
  0x4b   : > { %v304_v35 = vsel %vm302_vm3, %v303_v34, 0.0 }
  0x4c   : > { %v307_v36 = vsel %vm306_vm4, %v304_v35, 0.0 }
  0x4d   : > { %308 = vadd.xlane.f32.xlu0 %v307_v36 }
  0x55   : > { %325 = vadd.xlane.f32.xlu0 %v324_v39 }
  0xc0   : > { %v309_v40 = vpop.xlane.xlu0 %308 }
  0xc1   : > { %v310_v41 = vrot.slane %v309_v40, 4 }
  0xc3   : > { %v311_v42 = vadd.f32 %v310_v41, %v309_v40 }
  0xc5   : > { %v312_v43 = vrot.slane %v311_v42, 2 }
  0xc7   : > { %v313_v44 = vadd.f32 %v312_v43, %v311_v42 }
  0xc8   : > { %v326_v45 = vpop.xlane.xlu0 %325 }
  0xc9   : > { %v327_v46 = vrot.slane %v326_v45, 4  ;;  %v314_v47 = vrot.slane %v313_v44, 1 }
  0xcb   : > { %v328_v48 = vadd.f32 %v327_v46, %v326_v45  ;;  %v315_v49 = vadd.f32 %v314_v47, %v313_v44 }
  0xcd   : > { %v329_v50 = vrot.slane %v328_v48, 2  ;;  %474 = vpush %v315_v49 }
  0xcf   : > { %v330_v51 = vadd.f32 %v329_v50, %v328_v48 }
  0xd1   : > { %v331_v52 = vrot.slane %v330_v51, 1 }
  0xd3   : > { %v332_v53 = vadd.f32 %v331_v52, %v330_v51 }
  0xd5   : > { %476 = vpush %v332_v53 }
  0xfe   : > { %s475_s15 = spop %474 }
  0xff   : > { %v317_v55 = vstv %s475_s15 }
 0x100   : > { %v318_v56 = vadd.f32 %v317_v55, %v305_v54 }
 0x102   : > { %320 = vst.msk [vmem:[%s251_s7] sm:$0x1] %vm259_vm5, %v318_v56 }
 0x106   : > { %s477_s18 = spop %476 }
 0x107   : > { %v334_v58 = vstv %s477_s18 }
 0x108   : > { %v335_v59 = vadd.f32 %v334_v58, %v321_v57 }
 0x10a   : > { %336 = vst.msk [vmem:[%s254_s12] sm:$0x1] %vm259_vm5, %v335_v59 }
 0x10b PF: > { %s20_s17 = sadd.s32 1, %s667_s17   ;;  %s813_s12 = smov %s651_s13 }
 0x10c   : > { %p17_p0 = scmp.ge.s32.totalorder %s20_s17, 4   ;;  %s814_s13 = smov %s655_s14 }
 0x10d   : > { %s815_s14 = smov %s741_s24  ;;  %s816_s15 = smov %s663_s16 }
 0x10e   : > { %s817_s16 = smov %s819_s19  ;;  %19 = sbr.rel (!%p17_p0) target bundleno = 6 (0x6), region = 100 }
 0x113   :  { %366 = vsyncpa [#allocation3], 1 }
 0x114   :  { %368 = vsyncpa [#allocation3 + $0x1], 1 }
 0x115   :  { %369 = vsyncpa [#allocation5], 1 }
 0x116   :  { %371 = vsyncpa [#allocation5 + $0x1], 1 }

</bundles_post_ra>
